<compile_context>
chip_gen: v7x
topology: tpu7x:2x2x1
jax: 0.10.0
libtpu: 0.0.40
codegen_flags: <defaults>
</compile_context>

<pallas_src>
import jax
import jax.numpy as jnp
from jax import lax
from jax.experimental import pallas as pl
from jax.experimental.pallas import tpu as pltpu

_LANE = 128
_VMEM_LIMIT = 48 * 1024 * 1024  # > scoped defaults (16/32 MiB), < v7x physical 64 MiB


def _pick_row_tile(H, W, target_rows=1024):
    """Largest divisor of H whose row-tile (tile*W) is <=target and sublane-aligned."""
    row_tile = H
    for d in range(1, H + 1):
        if H % d == 0 and (d * W) % 8 == 0 and d * W <= target_rows:
            row_tile = d
    return row_tile


def conv_bn_relu(x_nchw, w_oihw, gamma, beta, *, eps=1e-5, pad=1,
                 row_tile=None, out_dtype=jnp.float32):
    """Forward pass of ConvBnReLU (kernel=3, stride=1, pad=1, dilation=1)."""
    N, Cin, H, W = x_nchw.shape
    Cout, Cin2, KH, KW = w_oihw.shape
    assert Cin2 == Cin and KH == 3 and KW == 3 and pad == 1, \
        "this kernel implements the module defaults: k=3, s=1, p=1, d=1"

    Cp = -(-Cout // _LANE) * _LANE            # lane-dense padded Cout
    Hp, Wp = H + 2 * pad, W + 2 * pad
    HW = H * W
    KKC = KH * KW * Cin
    group_kw = Cin < _LANE                    # small Cin: group KW taps per dot

    if row_tile is None:
        row_tile = _pick_row_tile(H, W)
    assert H % row_tile == 0 and (row_tile == H or (row_tile * W) % 8 == 0)
    TH = row_tile
    n_h = H // TH
    ROWS = TH * W

    # ---------------- kernels (closures over static shape params) ----------------
    def conv_rows(xp_ref, w_ref):
        """Conv for output rows [h*TH, h*TH+TH) -> (ROWS, Cp) f32 accumulator."""
        h = pl.program_id(1)
        row0 = pl.multiple_of(h * TH, TH)
        # One dynamic load of the rows (+halo) needed by this tile; all per-tap
        # slicing below is static on the VMEM-resident value (no re-loads).
        slab = xp_ref[pl.ds(row0, TH + KH - 1), :, :]          # (TH+2, Wp, Cin) bf16
        acc = jnp.zeros((ROWS, Cp), jnp.float32)
        for kh in range(KH):
            row_slab = slab[kh:kh + TH]                        # (TH, Wp, Cin)
            if group_kw:
                # contraction = KW*Cin per dot; slab is KW x smaller than full im2col
                lhs = jnp.concatenate(
                    [row_slab[:, kw:kw + W, :].reshape(ROWS, Cin) for kw in range(KW)],
                    axis=-1)                                   # (ROWS, KW*Cin)
                acc = acc + jnp.dot(lhs, w_ref[kh * KW * Cin:(kh + 1) * KW * Cin, :],
                                    preferred_element_type=jnp.float32)
            else:
                # Cin >= 128: pure accumulating tap dots, zero extra copies
                for kw in range(KW):
                    k0 = (kh * KW + kw) * Cin
                    patch = row_slab[:, kw:kw + W, :].reshape(ROWS, Cin)
                    acc = acc + jnp.dot(patch, w_ref[k0:k0 + Cin, :],
                                        preferred_element_type=jnp.float32)
        return acc

    def stats_kernel(xp_ref, w_ref, stats_ref):
        # stats_ref: (8, Cp) resident across the h axis; row 0 = sum, row 1 = sumsq
        @pl.when(pl.program_id(1) == 0)
        def _():
            stats_ref[...] = jnp.zeros_like(stats_ref)
        acc = conv_rows(xp_ref, w_ref)                         # (ROWS, Cp) f32
        part = jnp.concatenate(
            [jnp.sum(acc, axis=0, keepdims=True),
             jnp.sum(acc * acc, axis=0, keepdims=True)], axis=0)   # (2, Cp)
        stats_ref[0:2, :] += part

    def bn_relu_kernel(xp_ref, w_ref, scale_ref, shift_ref, o_ref):
        acc = conv_rows(xp_ref, w_ref)                         # (ROWS, Cp) f32
        y = acc * scale_ref[...] + shift_ref[...]              # f32 affine
        o_ref[...] = jnp.maximum(y, 0.0).astype(o_ref.dtype)

    # ---------------- operand prep (bf16 at the MXU boundary) ----------------
    x = jnp.transpose(x_nchw, (0, 2, 3, 1)).astype(jnp.bfloat16)           # NHWC
    xp = jnp.pad(x, ((0, 0), (pad, pad), (pad, pad), (0, 0)))
    w = jnp.transpose(w_oihw, (2, 3, 1, 0)).reshape(KKC, Cout)             # (KH*KW*Cin, Cout)
    w = jnp.pad(w, ((0, 0), (0, Cp - Cout))).astype(jnp.bfloat16)

    xp_spec = pl.BlockSpec((None, Hp, Wp, Cin), lambda n, h: (n, 0, 0, 0))  # same block ∀h
    w_spec = pl.BlockSpec((KKC, Cp), lambda n, h: (0, 0))                   # resident

    # ---- Pass 1: conv + per-image sum / sum-of-squares (no y writeback) ----
    stats = pl.pallas_call(
        stats_kernel,
        out_shape=jax.ShapeDtypeStruct((N, 8, Cp), jnp.float32),
        grid_spec=pltpu.PrefetchScalarGridSpec(
            num_scalar_prefetch=0,
            grid=(N, n_h),
            in_specs=[xp_spec, w_spec],
            out_specs=pl.BlockSpec((None, 8, Cp), lambda n, h: (n, 0, 0)),
        ),
        compiler_params=pltpu.CompilerParams(
            dimension_semantics=("parallel", "arbitrary"),
            vmem_limit_bytes=_VMEM_LIMIT),
    )(xp, w)

    # ---- Glue: reduce partials over N, fold batch stats + BN affine ----
    cnt = N * H * W
    ssum = jnp.sum(stats[:, 0, :], axis=0)                     # (Cp,)
    ssq = jnp.sum(stats[:, 1, :], axis=0)                      # (Cp,)
    mean = ssum / cnt
    var = jnp.maximum(ssq / cnt - mean * mean, 0.0)            # biased var (training BN)
    gamma_p = jnp.pad(gamma.astype(jnp.float32), (0, Cp - Cout))
    beta_p = jnp.pad(beta.astype(jnp.float32), (0, Cp - Cout))
    scale = gamma_p * lax.rsqrt(var + eps)
    shift = beta_p - mean * scale

    # ---- Pass 2: recompute conv, fused BN affine + ReLU, lane-dense store ----
    out = pl.pallas_call(
        bn_relu_kernel,
        out_shape=jax.ShapeDtypeStruct((N, HW, Cp), out_dtype),
        grid_spec=pltpu.PrefetchScalarGridSpec(
            num_scalar_prefetch=0,
            grid=(N, n_h),
            in_specs=[xp_spec, w_spec,
                      pl.BlockSpec((1, Cp), lambda n, h: (0, 0)),
                      pl.BlockSpec((1, Cp), lambda n, h: (0, 0))],
            out_specs=pl.BlockSpec((None, ROWS, Cp), lambda n, h: (n, h, 0)),
        ),
        compiler_params=pltpu.CompilerParams(
            dimension_semantics=("parallel", "parallel"),
            vmem_limit_bytes=_VMEM_LIMIT),
    )(xp, w, scale.reshape(1, Cp), shift.reshape(1, Cp))

    # drop channel padding, back to PyTorch NCHW (a real NHWC pipeline would skip this)
    out = out[:, :, :Cout].reshape(N, H, W, Cout)
    return jnp.transpose(out, (0, 3, 1, 2))


if __name__ == "__main__":
    key = jax.random.PRNGKey(0)
    k_x, k_w = jax.random.split(key)

    N, Cin, H, W = 2, 4, 16, 16
    Cout, K = 8, 3

    x = jax.random.normal(k_x, (N, Cin, H, W), jnp.float32)
    # Conv2d(in=4, out=8, k=3, bias=False) weight — deterministic synthetic init
    w = 0.1 * jax.random.normal(k_w, (Cout, Cin, K, K), jnp.float32)
    # BatchNorm2d default init: gamma=1, beta=0
    gamma = jnp.ones((Cout,), jnp.float32)
    beta = jnp.zeros((Cout,), jnp.float32)

    # row_tile=8 -> two H tiles per image, exercising the stats-accumulation path
    out = jax.block_until_ready(conv_bn_relu(x, w, gamma, beta, row_tile=8))

    # Reference (plain JAX): same bf16-quantized operands, f32 conv -> batch-stat BN -> ReLU
    x32 = x.astype(jnp.bfloat16).astype(jnp.float32)
    w32 = w.astype(jnp.bfloat16).astype(jnp.float32)
    y_ref = lax.conv_general_dilated(
        x32, w32, window_strides=(1, 1), padding=((1, 1), (1, 1)),
        dimension_numbers=("NCHW", "OIHW", "NCHW"),
        precision=lax.Precision.HIGHEST)
    mu = jnp.mean(y_ref, axis=(0, 2, 3), keepdims=True)
    vr = jnp.mean((y_ref - mu) ** 2, axis=(0, 2, 3), keepdims=True)
    ref = jnp.maximum(
        (y_ref - mu) / jnp.sqrt(vr + 1e-5) * gamma.reshape(1, -1, 1, 1)
        + beta.reshape(1, -1, 1, 1), 0.0)

    assert out.shape == (N, Cout, H, W), out.shape
    max_err = float(jnp.max(jnp.abs(out - ref)))
    assert jnp.allclose(out, ref, atol=1e-3, rtol=1e-3), max_err
    print("KERNEL_OK")
</pallas_src>

<mosaic_0001>
module attributes {stable_mosaic.version = 11 : i64} {
  func.func @stats_kernel(%arg0: i32, %arg1: i32, %arg2: memref<1x18x18x4xbf16, #tpu.memory_space<vmem>>, %arg3: memref<36x128xbf16, #tpu.memory_space<vmem>>, %arg4: memref<1x8x128xf32, #tpu.memory_space<vmem>>) attributes {dimension_semantics = [#tpu.dimension_semantics<parallel>, #tpu.dimension_semantics<arbitrary>], iteration_bounds = array<i64: 2, 2>, scalar_prefetch = 0 : i64, scratch_operands = 0 : i64, tpu.core_type = #tpu.core_type<tc>, window_params = [{transform_indices = @transform_0, window_bounds = array<i64: 1, 18, 18, 4>}, {pipeline_mode = #tpu.pipeline_mode<synchronous>, transform_indices = @transform_1, window_bounds = array<i64: 36, 128>}, {transform_indices = @transform_2, window_bounds = array<i64: 1, 8, 128>}]} {
    %c0_i32 = arith.constant 0 : i32
    %0 = arith.cmpi eq, %arg1, %c0_i32 : i32
    %1 = arith.extui %0 : i1 to i32
    %c0_i32_0 = arith.constant 0 : i32
    %2 = arith.cmpi ne, %1, %c0_i32_0 : i32
    scf.if %2 {
      %cst_18 = arith.constant 0.000000e+00 : f32
      %54 = vector.broadcast %cst_18 : f32 to vector<8x128xf32>
      %c0_19 = arith.constant 0 : index
      %c0_20 = arith.constant 0 : index
      %c0_21 = arith.constant 0 : index
      %55 = vector.load %arg4[%c0_19, %c0_20, %c0_21] : memref<1x8x128xf32, #tpu.memory_space<vmem>>, vector<1x8x128xf32>
      %56 = vector.shape_cast %55 : vector<1x8x128xf32> to vector<8x128xf32>
      %57 = vector.shape_cast %54 : vector<8x128xf32> to vector<1x8x128xf32>
      tpu.vector_store %arg4[%c0_19, %c0_20, %c0_21], %57 {strides = array<i32>} : memref<1x8x128xf32, #tpu.memory_space<vmem>>, vector<1x8x128xf32>,
    } else {
    }
    %c8_i32 = arith.constant 8 : i32
    %3 = arith.muli %arg1, %c8_i32 : i32
    %4 = tpu.assume_multiple %3, 8 : i32
    %c0 = arith.constant 0 : index
    %5 = arith.index_cast %4 : i32 to index
    %c0_1 = arith.constant 0 : index
    %c0_2 = arith.constant 0 : index
    %6 = vector.load %arg2[%c0, %5, %c0_1, %c0_2] : memref<1x18x18x4xbf16, #tpu.memory_space<vmem>>, vector<1x10x18x4xbf16>
    %7 = vector.shape_cast %6 : vector<1x10x18x4xbf16> to vector<10x18x4xbf16>
    %cst = arith.constant 0.000000e+00 : f32
    %8 = vector.broadcast %cst : f32 to vector<128x128xf32>
    %9 = vector.extract_strided_slice %7 {offsets = [0, 0, 0], sizes = [8, 18, 4], strides = [1, 1, 1]} : vector<10x18x4xbf16> to vector<8x18x4xbf16>
    %10 = vector.extract_strided_slice %9 {offsets = [0, 0, 0], sizes = [8, 16, 4], strides = [1, 1, 1]} : vector<8x18x4xbf16> to vector<8x16x4xbf16>
    %11 = vector.shape_cast %10 : vector<8x16x4xbf16> to vector<128x4xbf16>
    %12 = vector.extract_strided_slice %9 {offsets = [0, 1, 0], sizes = [8, 16, 4], strides = [1, 1, 1]} : vector<8x18x4xbf16> to vector<8x16x4xbf16>
    %13 = vector.shape_cast %12 : vector<8x16x4xbf16> to vector<128x4xbf16>
    %14 = vector.extract_strided_slice %9 {offsets = [0, 2, 0], sizes = [8, 16, 4], strides = [1, 1, 1]} : vector<8x18x4xbf16> to vector<8x16x4xbf16>
    %15 = vector.shape_cast %14 : vector<8x16x4xbf16> to vector<128x4xbf16>
    %16 = tpu.concatenate %11, %13, %15 in 1 : vector<128x4xbf16>, vector<128x4xbf16>, vector<128x4xbf16> -> vector<128x12xbf16>
    %c0_3 = arith.constant 0 : index
    %c0_4 = arith.constant 0 : index
    %17 = vector.load %arg3[%c0_3, %c0_4] : memref<36x128xbf16, #tpu.memory_space<vmem>>, vector<12x128xbf16>
    %cst_5 = arith.constant dense<0.000000e+00> : vector<128x128xf32>
    %18 = tpu.matmul %16, %17, %cst_5 {dimension_numbers = #tpu.dot_dimension_numbers<[1], [0], [0], [1], [0, 0, 1, 1], [], []>} : vector<128x12xbf16>, vector<12x128xbf16>, vector<128x128xf32> -> vector<128x128xf32>
    %19 = arith.addf %8, %18 : vector<128x128xf32>
    %20 = vector.extract_strided_slice %7 {offsets = [1, 0, 0], sizes = [8, 18, 4], strides = [1, 1, 1]} : vector<10x18x4xbf16> to vector<8x18x4xbf16>
    %21 = vector.extract_strided_slice %20 {offsets = [0, 0, 0], sizes = [8, 16, 4], strides = [1, 1, 1]} : vector<8x18x4xbf16> to vector<8x16x4xbf16>
    %22 = vector.shape_cast %21 : vector<8x16x4xbf16> to vector<128x4xbf16>
    %23 = vector.extract_strided_slice %20 {offsets = [0, 1, 0], sizes = [8, 16, 4], strides = [1, 1, 1]} : vector<8x18x4xbf16> to vector<8x16x4xbf16>
    %24 = vector.shape_cast %23 : vector<8x16x4xbf16> to vector<128x4xbf16>
    %25 = vector.extract_strided_slice %20 {offsets = [0, 2, 0], sizes = [8, 16, 4], strides = [1, 1, 1]} : vector<8x18x4xbf16> to vector<8x16x4xbf16>
    %26 = vector.shape_cast %25 : vector<8x16x4xbf16> to vector<128x4xbf16>
    %27 = tpu.concatenate %22, %24, %26 in 1 : vector<128x4xbf16>, vector<128x4xbf16>, vector<128x4xbf16> -> vector<128x12xbf16>
    %c12 = arith.constant 12 : index
    %c0_6 = arith.constant 0 : index
    %28 = vector.load %arg3[%c12, %c0_6] : memref<36x128xbf16, #tpu.memory_space<vmem>>, vector<12x128xbf16>
    %cst_7 = arith.constant dense<0.000000e+00> : vector<128x128xf32>
    %29 = tpu.matmul %27, %28, %cst_7 {dimension_numbers = #tpu.dot_dimension_numbers<[1], [0], [0], [1], [0, 0, 1, 1], [], []>} : vector<128x12xbf16>, vector<12x128xbf16>, vector<128x128xf32> -> vector<128x128xf32>
    %30 = arith.addf %19, %29 : vector<128x128xf32>
    %31 = vector.extract_strided_slice %7 {offsets = [2, 0, 0], sizes = [8, 18, 4], strides = [1, 1, 1]} : vector<10x18x4xbf16> to vector<8x18x4xbf16>
    %32 = vector.extract_strided_slice %31 {offsets = [0, 0, 0], sizes = [8, 16, 4], strides = [1, 1, 1]} : vector<8x18x4xbf16> to vector<8x16x4xbf16>
    %33 = vector.shape_cast %32 : vector<8x16x4xbf16> to vector<128x4xbf16>
    %34 = vector.extract_strided_slice %31 {offsets = [0, 1, 0], sizes = [8, 16, 4], strides = [1, 1, 1]} : vector<8x18x4xbf16> to vector<8x16x4xbf16>
    %35 = vector.shape_cast %34 : vector<8x16x4xbf16> to vector<128x4xbf16>
    %36 = vector.extract_strided_slice %31 {offsets = [0, 2, 0], sizes = [8, 16, 4], strides = [1, 1, 1]} : vector<8x18x4xbf16> to vector<8x16x4xbf16>
    %37 = vector.shape_cast %36 : vector<8x16x4xbf16> to vector<128x4xbf16>
    %38 = tpu.concatenate %33, %35, %37 in 1 : vector<128x4xbf16>, vector<128x4xbf16>, vector<128x4xbf16> -> vector<128x12xbf16>
    %c24 = arith.constant 24 : index
    %c0_8 = arith.constant 0 : index
    %39 = vector.load %arg3[%c24, %c0_8] : memref<36x128xbf16, #tpu.memory_space<vmem>>, vector<12x128xbf16>
    %cst_9 = arith.constant dense<0.000000e+00> : vector<128x128xf32>
    %40 = tpu.matmul %38, %39, %cst_9 {dimension_numbers = #tpu.dot_dimension_numbers<[1], [0], [0], [1], [0, 0, 1, 1], [], []>} : vector<128x12xbf16>, vector<12x128xbf16>, vector<128x128xf32> -> vector<128x128xf32>
    %41 = arith.addf %30, %40 : vector<128x128xf32>
    %cst_10 = arith.constant dense<0.000000e+00> : vector<128xf32>
    %42 = vector.multi_reduction <add>, %41, %cst_10 [0] : vector<128x128xf32> to vector<128xf32>
    %43 = vector.shape_cast %42 : vector<128xf32> to vector<1x128xf32>
    %44 = arith.mulf %41, %41 : vector<128x128xf32>
    %cst_11 = arith.constant dense<0.000000e+00> : vector<128xf32>
    %45 = vector.multi_reduction <add>, %44, %cst_11 [0] : vector<128x128xf32> to vector<128xf32>
    %46 = vector.shape_cast %45 : vector<128xf32> to vector<1x128xf32>
    %47 = tpu.concatenate %43, %46 in 0 : vector<1x128xf32>, vector<1x128xf32> -> vector<2x128xf32>
    %c0_12 = arith.constant 0 : index
    %c0_13 = arith.constant 0 : index
    %c0_14 = arith.constant 0 : index
    %48 = vector.load %arg4[%c0_12, %c0_13, %c0_14] : memref<1x8x128xf32, #tpu.memory_space<vmem>>, vector<1x2x128xf32>
    %49 = vector.shape_cast %48 : vector<1x2x128xf32> to vector<2x128xf32>
    %50 = arith.addf %49, %47 : vector<2x128xf32>
    %c0_15 = arith.constant 0 : index
    %c0_16 = arith.constant 0 : index
    %c0_17 = arith.constant 0 : index
    %51 = vector.load %arg4[%c0_15, %c0_16, %c0_17] : memref<1x8x128xf32, #tpu.memory_space<vmem>>, vector<1x2x128xf32>
    %52 = vector.shape_cast %51 : vector<1x2x128xf32> to vector<2x128xf32>
    %53 = vector.shape_cast %50 : vector<2x128xf32> to vector<1x2x128xf32>
    tpu.vector_store %arg4[%c0_15, %c0_16, %c0_17], %53 {strides = array<i32>} : memref<1x8x128xf32, #tpu.memory_space<vmem>>, vector<1x2x128xf32>,
    return
  }
  func.func @transform_0(%arg0: i32, %arg1: i32) -> (i32, i32, i32, i32) {
    %c0_i32 = arith.constant 0 : i32
    %c0_i32_0 = arith.constant 0 : i32
    %c0_i32_1 = arith.constant 0 : i32
    %c0_i32_2 = arith.constant 0 : i32
    return %arg0, %c0_i32, %c0_i32_0, %c0_i32_1 : i32, i32, i32, i32
  }
  func.func @transform_1(%arg0: i32, %arg1: i32) -> (i32, i32) {
    %c0_i32 = arith.constant 0 : i32
    %c0_i32_0 = arith.constant 0 : i32
    %c0_i32_1 = arith.constant 0 : i32
    return %c0_i32, %c0_i32_0 : i32, i32
  }
  func.func @transform_2(%arg0: i32, %arg1: i32) -> (i32, i32, i32) {
    %c0_i32 = arith.constant 0 : i32
    %c0_i32_0 = arith.constant 0 : i32
    %c0_i32_1 = arith.constant 0 : i32
    return %arg0, %c0_i32, %c0_i32_0 : i32, i32, i32
  }
}

</mosaic_0001>

<bundles_post_ra>
// kernel: tpu_custom_call.1
= control target key start
LH: loop header
LB: loop body
LE: loop exit
PB: predicated region body
PF: predicated region fallthrough
CT: control target
= control target key end

     0   :  { %7 = vsyncpa [#allocation3], 0  ;;  %s2109_s0 = inlined_call_operand.vmem [shape: bf16[2,18,18,4], index: 0, kind: input, shape index: {}]   ;;  %s2110_s1 = inlined_call_operand.vmem [shape: bf16[36,128], index: 1, kind: input, shape index: {}]   ;;  %s2111_s2 = inlined_call_operand.hbm [shape: f32[2,8,128], index: 2, kind: output, shape index: {}]  }
   0x1   :  { %9 = vsyncpa [#allocation3 + $0x1], 0  ;;  %s1636_s9 = smov 0   ;;  %s1638_s10 = smov 0  }
   0x2   :  { %s1640_s11 = smov 0   ;;  %s1642_s12 = smov 0  }
   0x3   :  { %s1644_s13 = smov 0   ;;  %s1646_s14 = smov 0  }
   0x4   :  { %s1648_s15 = smov 0   ;;  %s1650_s16 = smov 0  }
   0x5 LB: > { %s1231_s17 = sadd.s32 4294967295, %s1615_s16   ;;  %s1232_s18 = sadd.s32 4294967294, %s1615_s16   ;;  %s1615_s16 = sphi %s1650_s16, %s15_s16   ;;  %s1611_s15 = sphi %s1648_s15, %s2124_s15   ;;  %s1607_s14 = sphi %s1646_s14, %s2123_s14   ;;  %s1603_s13 = sphi %s1644_s13, %s2122_s13   ;;  %s1599_s12 = sphi %s1642_s12, %s2121_s12   ;;  %s1595_s11 = sphi %s1640_s11, %s2120_s11   ;;  %s1591_s10 = sphi %s1638_s10, %s2119_s10   ;;  %s1587_s9 = sphi %s1636_s9, %s2118_s9  }
   0x6   : > { %s24_s19 = sadd.s32 1, %s1607_s14  ;;  %s27_s20 = sadd.s32 1, %s1611_s15 }
   0x7   : > { %p25_p0 = scmp.ge.s32.totalorder %s24_s19, 2  ;;  %p91_p1 = scmp.ne.s32.totalorder %s1595_s11, %s1591_s10 }
   0x8   : > { %p92_p2 = scmp.eq.s32.totalorder %s1231_s17, 3  ;;  %p97_p4 = scmp.ne.s32.totalorder %s1591_s10, %s1587_s9 }
   0x9   : > { %s2126_s19 = smov (%p25_p0, %s24_s19), 0  ;;  %s2128_s20 = smov (!%p25_p0, %s27_s20), %s1611_s15 }
   0xa   : > { %p1685_p3 = por %p92_p2, %p91_p1  ;;  %p29_p5 = scmp.ge.s32.totalorder %s2128_s20, 2 }
   0xb   : > { %p98_p6 = scmp.eq.s32.totalorder %s1232_s18, 3  ;;  %p1235_p7 = scmp.ge.s32.totalorder %s1615_s16, 1 }
   0xc   : > { %p127_p8 = scmp.lt.s32.totalorder %s1615_s16, 5  ;;  %s2130_s20 = smov (%p29_p5, %s2128_s20), 0 }
   0xd   : > { %p1695_p9 = por %p98_p6, %p97_p4  ;;  %s78_s23 = ssub.s32 %s1611_s15, %s2130_s20 }
   0xe   : > { %p128_p10 = pnand %p1235_p7, %p127_p8  ;;  %s81_s24 = sadd.s32 1, %s1595_s11 }
   0xf   : > { %p79_p11 = scmp.eq.s32.totalorder %s78_s23, 0  ;;  %s146_s26 = sand.u32 (!%p128_p10), 1, %s1591_s10  }
  0x10   : > { %131 = sbr.rel (%p128_p10) target bundleno = 480 (0x1e0), region = 28  ;;  %p149_p12 = scmp.lt.s32.totalorder (!%p128_p10), %s1603_s13, 1 }
  0x11   : > { %s1703_s25 = scalar_select %p79_p11, %s1595_s11, %s81_s24  }
  0x12   : > { %s1236_s27 = sshll.u32 (!%p128_p10), %s146_s26, 3  ;;  %p1238_p13 = scmp.ne.s32.totalorder (!%p128_p10), %s1599_s12, 0 }
  0x13   : > { %s1713_s5 = scalar_lea.vmem (!%p128_p10), [#allocation2], %s1236_s27 }
  0x17   : > { %s150_s28 = scalar_select %p149_p12, %s1603_s13, 1 }
  0x18   : > { %158 = sbr.rel (%p1238_p13) target bundleno = 31 (0x1f), region = 32  ;;  %v1617_v0 = vmov (!%p1238_p13), 0.0  }
  0x19   : > { %s1433_s29 = smul.u32 216, %s150_s28  ;;  %159 = vst [vmem:[%s1713_s5] sm:$0xff] (!%p1238_p13), %v1617_v0 }
  0x1b   : > { %s153_s4 = scalar_lea.vmem %s2109_s0, %s1433_s29 }
  0x1f PF: > { %s1313_s6 = smul.u32 96, %s1599_s12  ;;  %vm413_vm0 = vcmask 1042432   ;;  %vm414_vm1 = vcmask 1046532   ;;  %vm194_vm2 = vsmask.f32 3328  ;;  %s1618_s8 = smov 8  }
  0x20   : > { %vm1720_vm3 = vmor %vm413_vm0, %vm414_vm1  ;;  %vm195_vm4 = vsmask.f32 7440  ;;  %s1619_s12 = smov 4   ;;  %vm697_vm6 = vcmask 1045504   ;;  %vm576_vm7 = vcmask 31744   ;;  %vm601_vm8 = vcmask 64512  }
  0x21   : > { %s1718_s7 = scalar_lea.vmem %s153_s4, %s1313_s6  ;;  %vm1762_vm5 = vmor %vm194_vm2, %vm195_vm4  ;;  %vm680_vm9 = vcmask 97280   ;;  %vm1140_vm10 = vcmask 1040384   ;;  %s1310_s29 = sshll.u32 %s1603_s13, 7 }
  0x22   : > { %v1725_v2 = vld [vmem:[%s1718_s7] sm:$0xf]  ;;  %v1728_v3 = vld [vmem:[%s1718_s7 + $0x4] sm:$0xf]  ;;  %v166_v4 = vld [vmem:[%s1718_s7 + $0x8] sm:$0x1]  ;;  %s2053_s6 = scalar_lea.hbm %s2111_s2, %s1310_s29 }
  0x23   : > { %v1242_v5 = vrot.slane %v1725_v2, 9  ;;  %v418_v6 = vrot.slane %v1728_v3, 5  ;;  %v421_v7 = vrot.slane %v166_v4, 5  ;;  %v198_v8 = vshrl.u32 %v1725_v2, 16  ;;  %v1735_v9 = vld [vmem:[%s1718_s7 + $0x18] sm:$0xf] }
  0x24   : > { %v201_v10 = vshll.u32 %v1725_v2, 16  ;;  %v207_v11 = vshll.u32 %v1728_v3, 16  ;;  %v211_v12 = vshrl.u32 %v1728_v3, 16  ;;  %v217_v13 = vshll.u32 %v166_v4, 16  ;;  %v1741_v14 = vld [vmem:[%s1718_s7 + $0x1c] sm:$0xf] }
  0x25   : > { %v419_v15 = vsel %vm1720_vm3, %v1242_v5, %v418_v6  ;;  %v420_v16 = vrot.slane %v418_v6, 4  ;;  %v200_v17 = vrot.slane %v198_v8, 4  ;;  %v1746_v18 = vld [vmem:[%s1718_s7 + $0x20] sm:$0x1]  ;;  %v246_v19 = vshrl.u32 %v1735_v9, 16  ;;  %s1159_s30 = sshll.u32 %s1713_s5, 4  ;;  %s2055_s30 = int_to_ptr.vmem [resolvable:$true] %s1159_s30 }
  0x26   : > { %v203_v20 = vrot.slane %v201_v10, 5  ;;  %v209_v21 = vrot.slane %v207_v11, 5  ;;  %v213_v22 = vrot.slane %v211_v12, 4  ;;  %v219_v23 = vrot.slane %v217_v13, 5  ;;  %v1750_v24 = vld [vmem:[%s1718_s7 + $0xc] sm:$0xf] }
  0x27   : > { %v422_v25 = vsel %vm1720_vm3, %v420_v16, %v421_v7  ;;  %v248_v26 = vrot.slane %v246_v19, 4  ;;  %v249_v27 = vshll.u32 %v1735_v9, 16  ;;  %v255_v28 = vshll.u32 %v1741_v14, 16  ;;  %v1758_v33 = vld [vmem:[%s1718_s7 + $0x10] sm:$0xf]  ;;  %s1620_s13 = smov [#allocation2]  }
  0x28   : > { %v1266_v29 = vcombine.low %v419_v15, %v422_v25  ;;  %v204_v30 = vor.u32 %v203_v20, %v200_v17  ;;  %v214_v31 = vor.u32 %v213_v22, %v209_v21  ;;  %v259_v32 = vshrl.u32 %v1741_v14, 16  ;;  %v169_v45 = vld [vmem:[%s1718_s7 + $0x14] sm:$0x1]  ;;  %v1784_v0 = vld [vmem:[%s1718_s7 + $0x30] sm:$0xf] }
  0x29   : > { %v251_v35 = vrot.slane %v249_v27, 5  ;;  %v257_v36 = vrot.slane %v255_v28, 5  ;;  %v265_v37 = vshll.u32 %v1746_v18, 16  ;;  %v222_v38 = vshrl.u32 %v1750_v24, 16  ;;  %v1790_v8 = vld [vmem:[%s1718_s7 + $0x34] sm:$0xf] }
  0x2a   : > { %560 = vrot.lane.b32.xlu1 %v1266_v29, %s1618_s8  ;;  %v205_v39 = vrot.slane %v204_v30, 4  ;;  %v215_v40 = vrot.slane %v214_v31, 4  ;;  %v261_v41 = vrot.slane %v259_v32, 4  ;;  %v225_v42 = vshll.u32 %v1750_v24, 16  ;;  %v1805_v25 = vld [vmem:[%s1718_s7 + $0x24] sm:$0xf] }
  0x2b   : > { %v252_v43 = vor.u32 %v251_v35, %v248_v26  ;;  %v267_v44 = vrot.slane %v265_v37, 5  ;;  %v224_v46 = vrot.slane %v222_v38, 4  ;;  %v231_v47 = vshll.u32 %v1758_v33, 16 }
  0x2c   : > { %v210_v48 = vsel %vm1762_vm5, %v205_v39, %v209_v21  ;;  %v220_v49 = vsel %vm1762_vm5, %v215_v40, %v219_v23  ;;  %v262_v50 = vor.u32 %v261_v41, %v257_v36  ;;  %v227_v51 = vrot.slane %v225_v42, 5  ;;  %v175_v40 = vld [vmem:[%s1718_s7 + $0x2c] sm:$0x1] }
  0x2d   : > { %v1258_v52 = vcombine.low %v210_v48, %v220_v49  ;;  %v253_v53 = vrot.slane %v252_v43, 4  ;;  %v233_v54 = vrot.slane %v231_v47, 5  ;;  %v235_v55 = vshrl.u32 %v1758_v33, 16 }
  0x2e   : > { %v263_v56 = vrot.slane %v262_v50, 4  ;;  %v228_v57 = vor.u32 %v227_v51, %v224_v46  ;;  %v241_v58 = vshll.u32 %v169_v45, 16  ;;  %v1244_v59 = vrot.slane %v1735_v9, 9 }
  0x2f   : > { %520 = vrot.lane.b32.xlu0 %v1258_v52, %s1619_s12  ;;  %v258_v60 = vsel %vm1762_vm5, %v253_v53, %v257_v36  ;;  %v237_v61 = vrot.slane %v235_v55, 4  ;;  %v432_v62 = vrot.slane %v1741_v14, 5  ;;  %v435_v63 = vrot.slane %v1746_v18, 5  ;;  %v178_v18 = vld [vmem:[%s1718_s7 + $0x38] sm:$0x1] }
  0x30   : > { %v268_v4 = vsel %vm1762_vm5, %v263_v56, %v267_v44  ;;  %v229_v5 = vrot.slane %v228_v57, 4  ;;  %v243_v6 = vrot.slane %v241_v58, 5  ;;  %v1243_v7 = vrot.slane %v1750_v24, 9  ;;  %v1813_v36 = vld [vmem:[%s1718_s7 + $0x28] sm:$0xf] }
  0x31   : > { %v1260_v10 = vcombine.low %v258_v60, %v268_v4  ;;  %v238_v11 = vor.u32 %v237_v61, %v233_v54  ;;  %v433_v12 = vsel %vm1720_vm3, %v1244_v59, %v432_v62  ;;  %v434_v13 = vrot.slane %v432_v62, 4 }
  0x32   : > { %v234_v15 = vsel %vm1762_vm5, %v229_v5, %v233_v54  ;;  %v425_v16 = vrot.slane %v1758_v33, 5  ;;  %v428_v17 = vrot.slane %v169_v45, 5  ;;  %v294_v19 = vshrl.u32 %v1784_v0, 16 }
  0x33   : > { %524 = vrot.lane.b32.xlu1 %v1260_v10, %s1619_s12  ;;  %v239_v20 = vrot.slane %v238_v11, 4  ;;  %v436_v21 = vsel %vm1720_vm3, %v434_v13, %v435_v63  ;;  %v297_v22 = vshll.u32 %v1784_v0, 16  ;;  %v303_v23 = vshll.u32 %v1790_v8, 16  ;;  %v1839_v13 = vld [vmem:[%s1718_s7 + $0x4c] sm:$0xf] }
  0x34   : > { %v1268_v26 = vcombine.low %v433_v12, %v436_v21  ;;  %v426_v27 = vsel %vm1720_vm3, %v1243_v7, %v425_v16  ;;  %v427_v28 = vrot.slane %v425_v16, 4  ;;  %v296_v29 = vrot.slane %v294_v19, 4 }
  0x35   : > { %v244_v30 = vsel %vm1762_vm5, %v239_v20, %v243_v6  ;;  %v299_v31 = vrot.slane %v297_v22, 5  ;;  %v305_v32 = vrot.slane %v303_v23, 5  ;;  %v307_v35 = vshrl.u32 %v1790_v8, 16  ;;  %v1832_v6 = vld [vmem:[%s1718_s7 + $0x48] sm:$0xf] }
  0x36   : > { %v1259_v37 = vcombine.low %v234_v15, %v244_v30  ;;  %v429_v38 = vsel %vm1720_vm3, %v427_v28, %v428_v17  ;;  %v313_v39 = vshll.u32 %v178_v18, 16  ;;  %v270_v41 = vshrl.u32 %v1805_v25, 16  ;;  %v1855_v30 = vld [vmem:[%s1718_s7 + $0x3c] sm:$0xf] }
  0x37   : > { %564 = vrot.lane.b32.xlu1 %v1268_v26, %s1618_s8  ;;  %v1267_v42 = vcombine.low %v426_v27, %v429_v38  ;;  %v300_v43 = vor.u32 %v299_v31, %v296_v29  ;;  %v309_v44 = vrot.slane %v307_v35, 4  ;;  %v273_v45 = vshll.u32 %v1805_v25, 16  ;;  %v1861_v38 = vld [vmem:[%s1718_s7 + $0x40] sm:$0xf] }
  0x38   : > { %522 = vrot.lane.b32.xlu0 %v1259_v37, %s1619_s12  ;;  %v315_v46 = vrot.slane %v313_v39, 5  ;;  %v272_v47 = vrot.slane %v270_v41, 4  ;;  %v279_v48 = vshll.u32 %v1813_v36, 16  ;;  %v283_v49 = vshrl.u32 %v1813_v36, 16  ;;  %v181_v39 = vld [vmem:[%s1718_s7 + $0x44] sm:$0x1] }
  0x39   : > { %v301_v50 = vrot.slane %v300_v43, 4  ;;  %v310_v51 = vor.u32 %v309_v44, %v305_v32  ;;  %v275_v52 = vrot.slane %v273_v45, 5  ;;  %v289_v53 = vshll.u32 %v175_v40, 16 }
  0x3a   : > { %v281_v54 = vrot.slane %v279_v48, 5  ;;  %v285_v55 = vrot.slane %v283_v49, 4  ;;  %v1246_v56 = vrot.slane %v1784_v0, 9  ;;  %v446_v57 = vrot.slane %v1790_v8, 5 }
  0x3b   : > { %v306_v58 = vsel %vm1762_vm5, %v301_v50, %v305_v32  ;;  %v311_v59 = vrot.slane %v310_v51, 4  ;;  %v276_v60 = vor.u32 %v275_v52, %v272_v47  ;;  %v291_v61 = vrot.slane %v289_v53, 5 }
  0x3c   : > { %562 = vrot.lane.b32.xlu0 %v1267_v42, %s1618_s8  ;;  %v286_v62 = vor.u32 %v285_v55, %v281_v54  ;;  %v447_v63 = vsel %vm1720_vm3, %v1246_v56, %v446_v57  ;;  %v448_v4 = vrot.slane %v446_v57, 4  ;;  %v449_v5 = vrot.slane %v178_v18, 5  ;;  %v184_v18 = vld [vmem:[%s1718_s7 + $0x50] sm:$0x1] }
  0x3d   : > { %v316_v7 = vsel %vm1762_vm5, %v311_v59, %v315_v46  ;;  %v277_v10 = vrot.slane %v276_v60, 4  ;;  %v1245_v11 = vrot.slane %v1805_v25, 9  ;;  %v439_v12 = vrot.slane %v1813_v36, 5 }
  0x3e   : > { %v1262_v15 = vcombine.low %v306_v58, %v316_v7  ;;  %v287_v16 = vrot.slane %v286_v62, 4  ;;  %v450_v17 = vsel %vm1720_vm3, %v448_v4, %v449_v5  ;;  %v442_v19 = vrot.slane %v175_v40, 5 }
  0x3f   : > { %v282_v20 = vsel %vm1762_vm5, %v277_v10, %v281_v54  ;;  %v1270_v21 = vcombine.low %v447_v63, %v450_v17  ;;  %v440_v22 = vsel %vm1720_vm3, %v1245_v11, %v439_v12  ;;  %v441_v23 = vrot.slane %v439_v12, 4  ;;  %v1878_v11 = vld [vmem:[%s1718_s7 + $0x54] sm:$0xf] }
  0x40   : > { %528 = vrot.lane.b32.xlu1 %v1262_v15, %s1619_s12  ;;  %v292_v26 = vsel %vm1762_vm5, %v287_v16, %v291_v61  ;;  %v342_v27 = vshrl.u32 %v1832_v6, 16  ;;  %v345_v28 = vshll.u32 %v1832_v6, 16  ;;  %v351_v29 = vshll.u32 %v1839_v13, 16 }
  0x41   : > { %v1261_v31 = vcombine.low %v282_v20, %v292_v26  ;;  %v443_v32 = vsel %vm1720_vm3, %v441_v23, %v442_v19  ;;  %v355_v35 = vshrl.u32 %v1839_v13, 16  ;;  %v361_v37 = vshll.u32 %v184_v18, 16  ;;  %v1885_v19 = vld [vmem:[%s1718_s7 + $0x58] sm:$0xf] }
  0x42   : > { %v1269_v40 = vcombine.low %v440_v22, %v443_v32  ;;  %v344_v41 = vrot.slane %v342_v27, 4  ;;  %v347_v42 = vrot.slane %v345_v28, 5  ;;  %v353_v43 = vrot.slane %v351_v29, 5  ;;  %v187_v28 = vld [vmem:[%s1718_s7 + $0x5c] sm:$0x1] }
  0x43   : > { %526 = vrot.lane.b32.xlu0 %v1261_v31, %s1619_s12  ;;  %v357_v44 = vrot.slane %v355_v35, 4  ;;  %v363_v45 = vrot.slane %v361_v37, 5  ;;  %v318_v46 = vshrl.u32 %v1855_v30, 16  ;;  %v321_v47 = vshll.u32 %v1855_v30, 16 }
  0x44   : > { %568 = vrot.lane.b32.xlu1 %v1270_v21, %s1618_s8  ;;  %v348_v48 = vor.u32 %v347_v42, %v344_v41  ;;  %v327_v49 = vshll.u32 %v1861_v38, 16  ;;  %v331_v50 = vshrl.u32 %v1861_v38, 16  ;;  %v337_v51 = vshll.u32 %v181_v39, 16 }
  0x45   : > { %v358_v52 = vor.u32 %v357_v44, %v353_v43  ;;  %v320_v53 = vrot.slane %v318_v46, 4  ;;  %v323_v54 = vrot.slane %v321_v47, 5  ;;  %v1248_v55 = vrot.slane %v1832_v6, 9 }
  0x46   : > { %v349_v56 = vrot.slane %v348_v48, 4  ;;  %v329_v57 = vrot.slane %v327_v49, 5  ;;  %v333_v58 = vrot.slane %v331_v50, 4  ;;  %v339_v59 = vrot.slane %v337_v51, 5  ;;  %v1907_v48 = vld [vmem:[%s1718_s7 + $0x64] sm:$0xf] }
  0x47   : > { %566 = vrot.lane.b32.xlu0 %v1269_v40, %s1618_s8  ;;  %v359_v60 = vrot.slane %v358_v52, 4  ;;  %v324_v61 = vor.u32 %v323_v54, %v320_v53  ;;  %v460_v62 = vrot.slane %v1839_v13, 5  ;;  %v463_v63 = vrot.slane %v184_v18, 5 }
  0x48   : > { %v354_v4 = vsel %vm1762_vm5, %v349_v56, %v353_v43  ;;  %v334_v5 = vor.u32 %v333_v58, %v329_v57  ;;  %v1247_v7 = vrot.slane %v1855_v30, 9  ;;  %v453_v10 = vrot.slane %v1861_v38, 5  ;;  %v1904_v43 = vld [vmem:[%s1718_s7 + $0x60] sm:$0xf] }
  0x49   : > { %v364_v12 = vsel %vm1762_vm5, %v359_v60, %v363_v45  ;;  %v325_v15 = vrot.slane %v324_v61, 4  ;;  %v461_v16 = vsel %vm1720_vm3, %v1248_v55, %v460_v62  ;;  %v462_v17 = vrot.slane %v460_v62, 4  ;;  %v190_v55 = vld [vmem:[%s1718_s7 + $0x68] sm:$0x1] }
  0x4a   : > { %v1264_v18 = vcombine.low %v354_v4, %v364_v12  ;;  %v335_v20 = vrot.slane %v334_v5, 4  ;;  %v454_v21 = vsel %vm1720_vm3, %v1247_v7, %v453_v10  ;;  %v455_v22 = vrot.slane %v453_v10, 4 }
  0x4b   : > { %v330_v23 = vsel %vm1762_vm5, %v325_v15, %v329_v57  ;;  %v464_v26 = vsel %vm1720_vm3, %v462_v17, %v463_v63  ;;  %v456_v27 = vrot.slane %v181_v39, 5  ;;  %v366_v29 = vshrl.u32 %v1878_v11, 16 }
  0x4c   : > { %532 = vrot.lane.b32.xlu1 %v1264_v18, %s1619_s12  ;;  %v340_v31 = vsel %vm1762_vm5, %v335_v20, %v339_v59  ;;  %v1272_v32 = vcombine.low %v461_v16, %v464_v26  ;;  %v369_v35 = vshll.u32 %v1878_v11, 16  ;;  %v375_v37 = vshll.u32 %v1885_v19, 16 }
  0x4d   : > { %v1263_v40 = vcombine.low %v330_v23, %v340_v31  ;;  %v457_v41 = vsel %vm1720_vm3, %v455_v22, %v456_v27  ;;  %v368_v42 = vrot.slane %v366_v29, 4  ;;  %v379_v39 = vshrl.u32 %v1885_v19, 16 }
  0x4e   : > { %v1271_v44 = vcombine.low %v454_v21, %v457_v41  ;;  %v371_v45 = vrot.slane %v369_v35, 5  ;;  %v377_v46 = vrot.slane %v375_v37, 5  ;;  %v385_v47 = vshll.u32 %v187_v28, 16  ;;  %v1926_v21 = vld [vmem:[%s1718_s7 + $0x6c] sm:$0xf] }
  0x4f   : > { %530 = vrot.lane.b32.xlu0 %v1263_v40, %s1619_s12  ;;  %v381_v49 = vrot.slane %v379_v39, 4  ;;  %v1249_v50 = vrot.slane %v1878_v11, 9  ;;  %v467_v51 = vrot.slane %v1885_v19, 5  ;;  %v470_v52 = vrot.slane %v187_v28, 5  ;;  %v1933_v28 = vld [vmem:[%s1718_s7 + $0x70] sm:$0xf] }
  0x50   : > { %572 = vrot.lane.b32.xlu1 %v1272_v32, %s1618_s8  ;;  %v372_v53 = vor.u32 %v371_v45, %v368_v42  ;;  %v387_v54 = vrot.slane %v385_v47, 5  ;;  %v621_v56 = vshrl.u32 %v1904_v43, 16  ;;  %v624_v57 = vshll.u32 %v1904_v43, 16  ;;  %v193_v37 = vld [vmem:[%s1718_s7 + $0x74] sm:$0x1]  ;;  %s1146_s7 = scalar_lea.sflag [#allocation3], %s146_s26 }
  0x51   : > { %v382_v58 = vor.u32 %v381_v49, %v377_v46  ;;  %v468_v59 = vsel %vm1720_vm3, %v1249_v50, %v467_v51  ;;  %v469_v60 = vrot.slane %v467_v51, 4  ;;  %v630_v61 = vshll.u32 %v1907_v48, 16 }
  0x52   : > { %v373_v62 = vrot.slane %v372_v53, 4  ;;  %v623_v63 = vrot.slane %v621_v56, 4  ;;  %v626_v4 = vrot.slane %v624_v57, 5  ;;  %v634_v5 = vshrl.u32 %v1907_v48, 16 }
  0x53   : > { %570 = vrot.lane.b32.xlu0 %v1271_v44, %s1618_s8  ;;  %v383_v7 = vrot.slane %v382_v58, 4  ;;  %v471_v10 = vsel %vm1720_vm3, %v469_v60, %v470_v52  ;;  %v632_v12 = vrot.slane %v630_v61, 5  ;;  %v640_v15 = vshll.u32 %v190_v55, 16  ;;  %v1511_v61 = vld [vmem:[%s2110_s1 + $0x4] sm:$0xfc]  }
  0x54   : > { %v378_v16 = vsel %vm1762_vm5, %v373_v62, %v377_v46  ;;  %v1273_v17 = vcombine.low %v468_v59, %v471_v10  ;;  %v627_v18 = vor.u32 %v626_v4, %v623_v63  ;;  %v636_v20 = vrot.slane %v634_v5, 4  ;;  %v1513_v10 = vld [vmem:[%s2110_s1 + $0xc] sm:$0x3f]  }
  0x55   : > { %v388_v22 = vsel %vm1762_vm5, %v383_v7, %v387_v54  ;;  %v642_v23 = vrot.slane %v640_v15, 5  ;;  %v1274_v26 = vrot.slane %v1904_v43, 9  ;;  %v649_v27 = vrot.slane %v1907_v48, 5  ;;  %v1512_v7 = vld [vmem:[%s2110_s1] sm:$0x3f]  }
  0x56   : > { %v1265_v29 = vcombine.low %v378_v16, %v388_v22  ;;  %574 = vrot.lane.b32.xlu1 %v1273_v17, %s1618_s8  ;;  %v628_v31 = vrot.slane %v627_v18, 4  ;;  %v637_v32 = vor.u32 %v636_v20, %v632_v12  ;;  %v652_v35 = vrot.slane %v190_v55, 5  ;;  %1430 = vmatprep.subr.msk.bf16.mxu0 %vm697_vm6, %v1512_v7 }
  0x57   : > { %v650_v40 = vsel %vm1720_vm3, %v1274_v26, %v649_v27  ;;  %v651_v41 = vrot.slane %v649_v27, 4  ;;  %v906_v42 = vshrl.u32 %v1926_v21, 16  ;;  %v909_v39 = vshll.u32 %v1926_v21, 16 }
  0x58   : > { %534 = vrot.lane.b32.xlu0 %v1265_v29, %s1619_s12  ;;  %v633_v44 = vsel %vm1762_vm5, %v628_v31, %v632_v12  ;;  %v638_v45 = vrot.slane %v637_v32, 4  ;;  %v915_v46 = vshll.u32 %v1933_v28, 16  ;;  %v919_v47 = vshrl.u32 %v1933_v28, 16 }
  0x59   : > { %v653_v49 = vsel %vm1720_vm3, %v651_v41, %v652_v35  ;;  %v908_v50 = vrot.slane %v906_v42, 4  ;;  %v911_v51 = vrot.slane %v909_v39, 5  ;;  %v925_v52 = vshll.u32 %v193_v37, 16 }
  0x5a   : > { %v643_v53 = vsel %vm1762_vm5, %v638_v45, %v642_v23  ;;  %v1277_v54 = vcombine.low %v650_v40, %v653_v49  ;;  %v917_v55 = vrot.slane %v915_v46, 5  ;;  %v921_v56 = vrot.slane %v919_v47, 4 }
  0x5b   : > { %v1276_v57 = vcombine.low %v633_v44, %v643_v53  ;;  %v912_v58 = vor.u32 %v911_v51, %v908_v50  ;;  %v927_v59 = vrot.slane %v925_v52, 5  ;;  %v1296_v60 = vrot.slane %v1926_v21, 9 }
  0x5c   : > { %665 = vrot.lane.b32.xlu1 %v1277_v54, %s1618_s8  ;;  %v922_v62 = vor.u32 %v921_v56, %v917_v55  ;;  %v934_v63 = vrot.slane %v1933_v28, 5  ;;  %v937_v4 = vrot.slane %v193_v37, 5  ;;  %v1250_v5 = vcombine.low %v1725_v2, %v1728_v3 }
  0x5d   : > { %660 = vrot.lane.b32.xlu0 %v1276_v57, %s1619_s12  ;;  %v913_v12 = vrot.slane %v912_v58, 4  ;;  %v1252_v15 = vcombine.low %v1735_v9, %v1741_v14  ;;  %v1251_v2 = vcombine.low %v1750_v24, %v1758_v33  ;;  %v679_v20 = vrot.slane %v1511_v61, 2 }
  0x5e   : > { %v923_v16 = vrot.slane %v922_v62, 4  ;;  %v935_v17 = vsel %vm1720_vm3, %v1296_v60, %v934_v63  ;;  %v936_v18 = vrot.slane %v934_v63, 4  ;;  %v1254_v22 = vcombine.low %v1784_v0, %v1790_v8 }
  0x5f   : > { %v918_v3 = vsel %vm1762_vm5, %v913_v12, %v917_v55  ;;  %v806_v14 = vsel %vm697_vm6, %v1512_v7, 0  ;;  %v967_v24 = vsel %vm697_vm6, %v1513_v10, 0  ;;  %1429 = vmatprep.subr.msk.bf16.mxu1 %vm697_vm6, %v679_v20  ;;  %v699_v27 = vsel %vm697_vm6, %v679_v20, 0 }
  0x60   : > { %v928_v23 = vsel %vm1762_vm5, %v923_v16, %v927_v59  ;;  %v938_v9 = vsel %vm1720_vm3, %v936_v18, %v937_v4  ;;  %1360 = vmatpush3.bf16.msra.mxu0 %v806_v14  ;;  %v1253_v34 = vcombine.low %v1805_v25, %v1813_v36  ;;  %1342 = vmatpush3.bf16.msra.mxu1 %v699_v27 }
  0x61   : > { %v1298_v33 = vcombine.low %v918_v3, %v928_v23  ;;  %v1299_v26 = vcombine.low %v935_v17, %v938_v9  ;;  %1432 = vmatprep.subr.msk.bf16.mxu0 %vm697_vm6, %v1513_v10  ;;  %v1256_v1 = vcombine.low %v1832_v6, %v1839_v13  ;;  %v1255_v0 = vcombine.low %v1855_v30, %v1861_v38 }
  0x62   : > { %v1257_v8 = vcombine.low %v1878_v11, %v1885_v19  ;;  %v1275_v29 = vcombine.low %v1904_v43, %v1907_v48  ;;  %v1297_v25 = vcombine.low %v1926_v21, %v1933_v28  ;;  %1431 = vmatprep.subr.msk.bf16.mxu1 %vm697_vm6, %v1512_v7 }
  0x63   : > { %945 = vrot.lane.b32.xlu0 %v1298_v33, %s1619_s12  ;;  %950 = vrot.lane.b32.xlu1 %v1299_v26, %s1618_s8  ;;  %s1521_s8 = scalar_lea.vmem %s2055_s30, 128  ;;  %s1525_s12 = sshll.u32 %s1620_s13, 4  ;;  %s1526_s12 = int_to_ptr.vmem [resolvable:$false] %s1525_s12 }
  0x64   : > { %p1522_p0 = scmp.ne.s32.totalorder %s2055_s30, %s1521_s8  ;;  %s1527_s17 = scalar_lea.vmem %s1526_s12, 256 }
  0x65   : > { %p1528_p4 = scmp.lt.s32.totalorder %s2055_s30, %s1526_s12  ;;  %p1529_p5 = scmp.lt.s32.totalorder %s1527_s17, %s1521_s8 }
  0x66   : > { %p1523_p1 = pnand %p1522_p0, %p1685_p3 }
  0x67   : > { %p1530_p6 = por %p1529_p5, %p1528_p4 }
  0x68   : > { %p1524_p2 = pneg %p1523_p1 }
  0x6a   : > { %p1531_p7 = pnand %p1530_p6, %p1524_p2 }
  0x9c   : > { %v561_v36 = vpop.permute.xlu1 %560 }
  0xa1   : > { %v521_v6 = vpop.permute.xlu0 %520 }
  0xa2   : > { %v579_v13 = vsel %vm576_vm7, %v1250_v5, %v521_v6 }
  0xa3   : > { %v603_v30 = vsel %vm601_vm8, %v579_v13, %v561_v36 }
  0xa4   : > { %1361 = vmatprep.mubr.msk.bf16.mxu0 %vm680_vm9, %v603_v30 }
  0xa5   : > { %v525_v38 = vpop.permute.xlu1 %524 }
  0xa6   : > { %v585_v43 = vsel %vm576_vm7, %v1252_v15, %v525_v38 }
  0xa9   : > { %v565_v19 = vpop.permute.xlu1 %564 }
  0xaa   : > { %v523_v11 = vpop.permute.xlu0 %522  ;;  %v607_v35 = vsel %vm601_vm8, %v585_v43, %v565_v19 }
  0xab   : > { %v582_v48 = vsel %vm576_vm7, %v1251_v2, %v523_v11 }
  0xae   : > { %v563_v31 = vpop.permute.xlu0 %562 }
  0xaf   : > { %v605_v32 = vsel %vm601_vm8, %v582_v48, %v563_v31 }
  0xb0   : > { %1343 = vmatprep.mubr.msk.bf16.mxu1 %vm680_vm9, %v605_v32  ;;  %1362 = vmatmul.mubr.msk.bf16.vlgmr.msra.gmra.mrb[0].mxu0 %vm680_vm9, %v605_v32 }
  0xb1   : > { %1344 = vmatmul.mubr.msk.bf16.vlgmr.msra.gmra.mrb[0].mxu1 %vm680_vm9, %v607_v35  ;;  %1365 = vmatprep.mubr.msk.bf16.mxu0 %vm680_vm9, %v607_v35 }
  0xb2   : > { %v529_v37 = vpop.permute.xlu1 %528  ;;  %1396 = vmatpush3.bf16.msra.mxu1 %v806_v14  ;;  %1378 = vmatpush3.bf16.msra.mxu0 %v967_v24 }
  0xb3   : > { %v591_v41 = vsel %vm576_vm7, %v1254_v22, %v529_v37 }
  0xb5   : > { %v527_v40 = vpop.permute.xlu0 %526 }
  0xb6   : > { %v569_v42 = vpop.permute.xlu1 %568  ;;  %v588_v39 = vsel %vm576_vm7, %v1253_v34, %v527_v40 }
  0xb7   : > { %v611_v46 = vsel %vm601_vm8, %v591_v41, %v569_v42 }
  0xb9   : > { %v567_v44 = vpop.permute.xlu0 %566 }
  0xba   : > { %v609_v45 = vsel %vm601_vm8, %v588_v39, %v567_v44 }
  0xbb   : > { %1347 = vmatprep.mubr.msk.bf16.mxu1 %vm680_vm9, %v609_v45  ;;  %1366 = vmatmul.mubr.msk.bf16.gmra.mrb[4].mxu0 %vm680_vm9, %v609_v45 }
  0xbc   : > { %1348 = vmatmul.mubr.msk.bf16.gmra.mrb[4].mxu1 %vm680_vm9, %v611_v46  ;;  %1379 = vmatprep.mubr.msk.bf16.mxu0 %vm680_vm9, %v607_v35 }
  0xbe   : > { %v533_v47 = vpop.permute.xlu1 %532 }
  0xbf   : > { %v597_v50 = vsel %vm576_vm7, %v1256_v1, %v533_v47 }
  0xc1   : > { %v531_v49 = vpop.permute.xlu0 %530 }
  0xc2   : > { %v573_v51 = vpop.permute.xlu1 %572  ;;  %v594_v52 = vsel %vm576_vm7, %v1255_v0, %v531_v49 }
  0xc3   : > { %1380 = vmatmul.mubr.msk.bf16.vlgmr.msra.gmra.mrb[0].mxu0 %vm680_vm9, %v609_v45  ;;  %v615_v55 = vsel %vm601_vm8, %v597_v50, %v573_v51 }
  0xc4   : > { %1383 = vmatprep.mubr.msk.bf16.mxu0 %vm680_vm9, %v611_v46 }
  0xc5   : > { %v571_v53 = vpop.permute.xlu0 %570 }
  0xc6   : > { %v613_v54 = vsel %vm601_vm8, %v594_v52, %v571_v53 }
  0xc7   : > { %1351 = vmatprep.mubr.msk.bf16.mxu1 %vm680_vm9, %v613_v54 }
  0xc8   : > { %1352 = vmatmul.mubr.msk.bf16.gmra.mrb[8].mxu1 %vm680_vm9, %v615_v55  ;;  %v575_v56 = vpop.permute.xlu1 %574 }
  0xca   : > { %v535_v57 = vpop.permute.xlu0 %534 }
  0xcb   : > { %v600_v58 = vsel %vm576_vm7, %v1257_v8, %v535_v57  ;;  %1384 = vmatmul.mubr.msk.bf16.gmra.mrb[4].mxu0 %vm680_vm9, %v613_v54 }
  0xcc   : > { %v617_v59 = vsel %vm601_vm8, %v600_v58, %v575_v56  ;;  %1387 = vmatprep.mubr.msk.bf16.mxu0 %vm680_vm9, %v615_v55 }
  0xcd   : > { %1355 = vmatprep.mubr.msk.bf16.mxu1 %vm680_vm9, %v617_v59 }
  0xce   : > { %v666_v60 = vpop.permute.xlu1 %665 }
  0xcf   : > { %v661_v61 = vpop.permute.xlu0 %660 }
  0xd0   : > { %v669_v62 = vsel %vm576_vm7, %v1275_v29, %v661_v61 }
  0xd1   : > { %v671_v63 = vsel %vm601_vm8, %v669_v62, %v666_v60 }
  0xd2   : > { %1356 = vmatmul.mubr.msk.bf16.gmra.mrb[12].mxu1 %vm680_vm9, %v671_v63 }
  0xd3   : > { %1369 = vmatprep.mubr.msk.bf16.mxu1 %vm680_vm9, %v611_v46  ;;  %1388 = vmatmul.mubr.msk.bf16.gmra.mrb[8].mxu0 %vm680_vm9, %v617_v59 }
  0xd4   : > { %1391 = vmatprep.mubr.msk.bf16.mxu0 %vm680_vm9, %v671_v63 }
  0xd5   : > { %v946_v4 = vpop.permute.xlu0 %945  ;;  %v951_v5 = vpop.permute.xlu1 %950 }
  0xd6   : > { %v954_v7 = vsel %vm576_vm7, %v1297_v25, %v946_v4 }
  0xd7   : > { %v956_v10 = vsel %vm601_vm8, %v954_v7, %v951_v5 }
  0xda   : > { %1370 = vmatmul.mubr.msk.bf16.vlgmr.msra.gmra.mrb[8].mxu1 %vm680_vm9, %v613_v54 }
  0xdb   : > { %1373 = vmatprep.mubr.msk.bf16.mxu1 %vm680_vm9, %v615_v55  ;;  %1392 = vmatmul.mubr.msk.bf16.gmra.mrb[12].mxu0 %vm680_vm9, %v956_v10 }
  0xe2   : > { %1374 = vmatmul.mubr.msk.bf16.gmra.mrb[12].mxu1 %vm680_vm9, %v617_v59 }
 0x184   : > { %v1345_v12 = vpop.f32.mrb[0].mxu1 }
 0x185   : > { %v735_v15 = vpop.f32.mrb[1].mxu1 }
 0x186   : > { %v1346_v16 = vpop.f32.mrb[2].mxu1 }
 0x187   : > { %v738_v17 = vpop.f32.mrb[3].mxu1 }
 0x18f   : > { %v1349_v18 = vpop.f32.mrb[4].mxu1 }
 0x190   : > { %v751_v2 = vpop.f32.mrb[5].mxu1 }
 0x191   : > { %v1350_v3 = vpop.f32.mrb[6].mxu1 }
 0x192   : > { %v754_v21 = vpop.f32.mrb[7].mxu1 }
 0x196   : > { %v1381_v28 = vpop.f32.mrb[0].mxu0 }
 0x197   : > { %v1397_v20 = vadd.f32 %v1381_v28, %v1345_v12  ;;  %v1003_v22 = vpop.f32.mrb[1].mxu0 }
 0x198   : > { %v1398_v23 = vadd.f32 %v1003_v22, %v735_v15  ;;  %v1382_v9 = vpop.f32.mrb[2].mxu0 }
 0x199   : > { %v1399_v14 = vadd.f32 %v1382_v9, %v1346_v16  ;;  %v1006_v24 = vpop.f32.mrb[3].mxu0  ;;  %v1105_v1 = vmul.f32 %v1397_v20, %v1397_v20 }
 0x19a   : > { %v1400_v33 = vadd.f32 %v1006_v24, %v738_v17  ;;  %v1103_v26 = vmul.f32 %v1398_v23, %v1398_v23 }
 0x19b   : > { %v1106_v6 = vmul.f32 %v1399_v14, %v1399_v14 }
 0x19c   : > { %v1082_v27 = vadd.f32 %v1400_v33, %v1398_v23  ;;  %v1104_v34 = vmul.f32 %v1400_v33, %v1400_v33 }
 0x19e   : > { %v1083_v0 = vadd.f32 %v1397_v20, %v1082_v27  ;;  %v1119_v8 = vadd.f32 %v1104_v34, %v1103_v26  ;;  %v1385_v29 = vpop.f32.mrb[4].mxu0 }
 0x19f   : > { %v1401_v25 = vadd.f32 %v1385_v29, %v1349_v18  ;;  %v1019_v36 = vpop.f32.mrb[5].mxu0 }
 0x1a0   : > { %v1120_v13 = vadd.f32 %v1119_v8, %v1105_v1  ;;  %v1402_v30 = vadd.f32 %v1019_v36, %v751_v2  ;;  %v1084_v38 = vadd.f32 %v1399_v14, %v1083_v0  ;;  %v1386_v11 = vpop.f32.mrb[6].mxu0 }
 0x1a1   : > { %v1403_v19 = vadd.f32 %v1386_v11, %v1350_v3  ;;  %v1022_v43 = vpop.f32.mrb[7].mxu0  ;;  %v1109_v42 = vmul.f32 %v1401_v25, %v1401_v25 }
 0x1a2   : > { %v1085_v48 = vadd.f32 %v1402_v30, %v1084_v38  ;;  %v1107_v31 = vmul.f32 %v1402_v30, %v1402_v30  ;;  %v1121_v32 = vadd.f32 %v1120_v13, %v1106_v6  ;;  %v1404_v35 = vadd.f32 %v1022_v43, %v754_v21 }
 0x1a3   : > { %v1110_v47 = vmul.f32 %v1403_v19, %v1403_v19 }
 0x1a4   : > { %v1122_v37 = vadd.f32 %v1121_v32, %v1107_v31  ;;  %v1086_v40 = vadd.f32 %v1404_v35, %v1085_v48  ;;  %v1108_v41 = vmul.f32 %v1404_v35, %v1404_v35 }
 0x1a6   : > { %v1087_v39 = vadd.f32 %v1401_v25, %v1086_v40  ;;  %v1123_v44 = vadd.f32 %v1122_v37, %v1108_v41  ;;  %v1389_v45 = vpop.f32.mrb[8].mxu0 }
 0x1a7   : > { %v1035_v46 = vpop.f32.mrb[9].mxu0 }
 0x1a8   : > { %v1124_v49 = vadd.f32 %v1123_v44, %v1109_v42  ;;  %v1088_v50 = vadd.f32 %v1403_v19, %v1087_v39  ;;  %v1390_v51 = vpop.f32.mrb[10].mxu0 }
 0x1a9   : > { %v1038_v52 = vpop.f32.mrb[11].mxu0 }
 0x1aa   : > { %v1125_v53 = vadd.f32 %v1124_v49, %v1110_v47 }
 0x1ad   : > { %v1371_v54 = vpop.f32.mrb[8].mxu1 }
 0x1ae   : > { %v1405_v55 = vadd.f32 %v1389_v45, %v1371_v54  ;;  %v874_v56 = vpop.f32.mrb[9].mxu1  ;;  %v1393_v57 = vpop.f32.mrb[12].mxu0  ;;  %v1142_v45 = vld [vmem:[%s1713_s5] sm:$0x3] }
 0x1af   : > { %v1406_v58 = vadd.f32 %v1035_v46, %v874_v56  ;;  %v1372_v59 = vpop.f32.mrb[10].mxu1  ;;  %v1051_v60 = vpop.f32.mrb[13].mxu0 }
 0x1b0   : > { %v1407_v61 = vadd.f32 %v1390_v51, %v1372_v59  ;;  %v877_v62 = vpop.f32.mrb[11].mxu1  ;;  %v1394_v63 = vpop.f32.mrb[14].mxu0  ;;  %v1113_v17 = vmul.f32 %v1405_v55, %v1405_v55 }
 0x1b1   : > { %v1089_v4 = vadd.f32 %v1406_v58, %v1088_v50  ;;  %v1111_v5 = vmul.f32 %v1406_v58, %v1406_v58  ;;  %v1408_v7 = vadd.f32 %v1038_v52, %v877_v62  ;;  %v1054_v10 = vpop.f32.mrb[15].mxu0 }
 0x1b2   : > { %v1114_v20 = vmul.f32 %v1407_v61, %v1407_v61 }
 0x1b3   : > { %v1126_v12 = vadd.f32 %v1125_v53, %v1111_v5  ;;  %v1090_v15 = vadd.f32 %v1408_v7, %v1089_v4  ;;  %v1112_v16 = vmul.f32 %v1408_v7, %v1408_v7 }
 0x1b5   : > { %v1091_v18 = vadd.f32 %v1405_v55, %v1090_v15  ;;  %v1127_v2 = vadd.f32 %v1126_v12, %v1112_v16  ;;  %v1375_v3 = vpop.f32.mrb[12].mxu1 }
 0x1b6   : > { %v1409_v21 = vadd.f32 %v1393_v57, %v1375_v3  ;;  %v890_v28 = vpop.f32.mrb[13].mxu1 }
 0x1b7   : > { %v1128_v22 = vadd.f32 %v1127_v2, %v1113_v17  ;;  %v1410_v23 = vadd.f32 %v1051_v60, %v890_v28  ;;  %v1092_v9 = vadd.f32 %v1407_v61, %v1091_v18  ;;  %v1376_v14 = vpop.f32.mrb[14].mxu1 }
 0x1b8   : > { %v1411_v24 = vadd.f32 %v1394_v63, %v1376_v14  ;;  %v893_v33 = vpop.f32.mrb[15].mxu1  ;;  %v1117_v25 = vmul.f32 %v1409_v21, %v1409_v21 }
 0x1b9   : > { %v1093_v26 = vadd.f32 %v1410_v23, %v1092_v9  ;;  %v1115_v27 = vmul.f32 %v1410_v23, %v1410_v23  ;;  %v1129_v34 = vadd.f32 %v1128_v22, %v1114_v20  ;;  %v1412_v1 = vadd.f32 %v1054_v10, %v893_v33 }
 0x1ba   : > { %v1118_v13 = vmul.f32 %v1411_v24, %v1411_v24 }
 0x1bb   : > { %v1130_v0 = vadd.f32 %v1129_v34, %v1115_v27  ;;  %v1094_v8 = vadd.f32 %v1412_v1, %v1093_v26  ;;  %v1116_v29 = vmul.f32 %v1412_v1, %v1412_v1 }
 0x1bd   : > { %v1095_v36 = vadd.f32 %v1409_v21, %v1094_v8  ;;  %v1131_v6 = vadd.f32 %v1130_v0, %v1116_v29 }
 0x1bf   : > { %v1096_v30 = vadd.f32 %v1411_v24, %v1095_v36  ;;  %v1132_v38 = vadd.f32 %v1131_v6, %v1117_v25 }
 0x1c1   : > { %v1097_v11 = vrot.slane %v1096_v30, 4  ;;  %v1133_v19 = vadd.f32 %v1132_v38, %v1118_v13 }
 0x1c3   : > { %v1098_v43 = vadd.f32 %v1097_v11, %v1096_v30  ;;  %v1134_v48 = vrot.slane %v1133_v19, 4 }
 0x1c5   : > { %v1099_v31 = vrot.slane %v1098_v43, 2  ;;  %v1135_v32 = vadd.f32 %v1134_v48, %v1133_v19 }
 0x1c7   : > { %v1100_v35 = vadd.f32 %v1099_v31, %v1098_v43  ;;  %v1136_v37 = vrot.slane %v1135_v32, 2 }
 0x1c9   : > { %v1101_v40 = vrot.slane %v1100_v35, 1  ;;  %v1137_v41 = vadd.f32 %v1136_v37, %v1135_v32 }
 0x1cb   : > { %v1138_v42 = vrot.slane %v1137_v41, 1  ;;  %v1102_v39 = vadd.f32 %v1101_v40, %v1100_v35 }
 0x1cd   : > { %v1139_v44 = vadd.f32 %v1138_v42, %v1137_v41 }
 0x1cf   : > { %v1141_v46 = vsel %vm1140_vm10, %v1102_v39, %v1139_v44 }
 0x1d0   : > { %v1143_v47 = vadd.f32 %v1142_v45, %v1141_v46 }
 0x1d2   : > { %1144 = vst [vmem:[%s1713_s5] sm:$0x3] %v1143_v47 }
 0x1d3   : > { %1534 = shalt.err (!%p1531_p7)
}
 0x1d4   : > { %s1535_s26 = scalar_lea.hbm %s2053_s6, 128  ;;  %s1539_s23 = scalar_lea.hbm %s2111_s2, 256 }
 0x1d5   : > { %p1536_p8 = scmp.ne.s32.totalorder %s2053_s6, %s1535_s26  ;;  %p1540_p12 = scmp.lt.u32.totalorder %s2053_s6, %s2111_s2 }
 0x1d6   : > { %p1541_p13 = scmp.lt.u32.totalorder %s1539_s23, %s1535_s26  ;;  %p1543_p1 = scmp.lt.u32.totalorder %s1535_s26, %s2053_s6 }
 0x1d7   : > { %p1537_p10 = pnand %p1536_p8, %p1685_p3 }
 0x1d8   : > { %p1542_p0 = por %p1541_p13, %p1540_p12 }
 0x1d9   : > { %p1538_p11 = pneg %p1537_p10 }
 0x1da   : > { %p1544_p2 = por %p1543_p1, %p1542_p0 }
 0x1dc   : > { %p1545_p4 = pnand %p1544_p2, %p1538_p11 }
 0x1de   : > { %1548 = shalt.err (!%p1545_p4)
}
 0x1df   : > { %1434 = dma.vmem_to_hbm [thread:$0]  (%p1685_p3), %s2055_s30, 128, %s2053_s6, %s1146_s7  }
 0x1e0 PF: > { %p1440_p5 = scmp.ge.s32.totalorder %s1615_s16, 2  ;;  %s1171_s28 = sand.u32 1, %s1587_s9  }
 0x1e1   : > { %s1172_s29 = scalar_lea.sflag [#allocation3], %s1171_s28 }
 0x1e2   : > { %p1437_p6 = pnand %p1440_p5, %p1695_p9 }
 0x1e4   : > { %1582 = dma.done.wait (!%p1437_p6), %s1172_s29, 128  }
 0x1e5   : > { %1584 = vsyncadd (!%p1437_p6), %s1172_s29, 4294967168  ;;  %s15_s16 = sadd.s32 1, %s1615_s16   ;;  %s2118_s9 = smov %s1591_s10 }
 0x1e6   : > { %p12_p7 = scmp.ge.s32.totalorder %s15_s16, 6   ;;  %s2119_s10 = smov %s1595_s11 }
 0x1e7   : > { %s2120_s11 = smov %s1703_s25  ;;  %s2121_s12 = smov %s1607_s14 }
 0x1e8   : > { %s2122_s13 = smov %s1611_s15  ;;  %s2123_s14 = smov %s2126_s19 }
 0x1e9   : > { %s2124_s15 = smov %s2130_s20  ;;  %14 = sbr.rel (!%p12_p7) target bundleno = 5 (0x5), region = 68 }
 0x1f0   :  { %1177 = vsyncpa [#allocation3], 1 }
 0x1f1   :  { %1179 = vsyncpa [#allocation3 + $0x1], 1 }

</bundles_post_ra>
